<compile_context>
chip_gen: v7x
topology: tpu7x:2x2x1
jax: 0.10.0
libtpu: 0.0.40
codegen_flags: <defaults>
</compile_context>

<pallas_src>
import jax
import jax.numpy as jnp
from jax.experimental import pallas as pl
from jax.experimental.pallas import tpu as pltpu  # noqa: F401  (TPU backend)


def _passthrough_kernel(in_ref, kern_ref, in_out_ref, kern_out_ref):
    # The entire forward pass: return the two parameters unchanged.
    in_out_ref[...] = in_ref[...]
    kern_out_ref[...] = kern_ref[...]


def _channel_in_kernel_forward_pallas(params_in, params_kernel):
    """Pallas pass-through of ChannelInKernel.forward().

    Args:
      params_in:     (1, 1, c_in, 1, 1) float array.
      params_kernel: (1, 1, 1, 3, 3)    float array.
    Returns:
      dict {'in': ..., 'kernel': ...} with identical shapes/dtypes.
    """
    _, _, c_in, _, _ = params_in.shape

    # Lane-dense 2-D views (larger dim last); full-array blocks are legal
    # regardless of (8, 128) alignment because block_shape == array dims.
    in_2d = params_in.reshape(1, c_in)
    kern_2d = params_kernel.reshape(1, 9)

    out_in, out_kern = pl.pallas_call(
        _passthrough_kernel,
        out_shape=(
            jax.ShapeDtypeStruct(in_2d.shape, in_2d.dtype),
            jax.ShapeDtypeStruct(kern_2d.shape, kern_2d.dtype),
        ),
        # Single grid point, full-array blocks — no tiling needed for these
        # tiny parameter tensors on any TPU generation.
        in_specs=[
            pl.BlockSpec(in_2d.shape, lambda: (0, 0)),
            pl.BlockSpec(kern_2d.shape, lambda: (0, 0)),
        ],
        out_specs=(
            pl.BlockSpec(in_2d.shape, lambda: (0, 0)),
            pl.BlockSpec(kern_2d.shape, lambda: (0, 0)),
        ),
        # Alias outputs onto inputs: in-place pass-through, no extra HBM bytes.
        input_output_aliases={0: 0, 1: 1},
    )(in_2d, kern_2d)

    return {
        'in': out_in.reshape(params_in.shape),
        'kernel': out_kern.reshape(params_kernel.shape),
    }


# JIT the Pallas path so the reshape glue fuses away around the custom call.
_channel_in_kernel_forward_pallas_jit = jax.jit(_channel_in_kernel_forward_pallas)


class ChannelInKernelPallas:
    """Mirror of the PyTorch ChannelInKernel module (parameter container)."""

    def __init__(self, conv_dimension, use_pallas=False):
        c_in, c_out = conv_dimension
        # Deterministic init, exactly as nn.Parameter(torch.zeros(...)).
        self.params_in = jnp.zeros((1, 1, c_in, 1, 1), dtype=jnp.float32)
        self.params_kernel = jnp.zeros((1, 1, 1, 3, 3), dtype=jnp.float32)
        self.use_pallas = use_pallas

    def __call__(self):
        if self.use_pallas:
            return _channel_in_kernel_forward_pallas_jit(
                self.params_in, self.params_kernel)
        # Preferred (zero-cost) path: the forward is a pure identity, so just
        # return the parameters — no HBM traffic, no kernel-launch overhead.
        return {'in': self.params_in, 'kernel': self.params_kernel}


if __name__ == "__main__":
    # Small shapes consistent with the module: conv_dimension = (c_in, c_out).
    c_in, c_out = 4, 8

    # --- Module forward with its real (zero) parameters, default fast path ---
    module = ChannelInKernelPallas((c_in, c_out))
    out = module()
    out_in = jax.block_until_ready(out['in'])
    out_kern = jax.block_until_ready(out['kernel'])
    assert out_in.shape == (1, 1, c_in, 1, 1) and out_in.dtype == jnp.float32
    assert out_kern.shape == (1, 1, 1, 3, 3) and out_kern.dtype == jnp.float32
    assert bool(jnp.all(out_in == 0.0)) and bool(jnp.all(out_kern == 0.0))

    # --- Exercise the Pallas kernel path on deterministic non-zero data ------
    key = jax.random.PRNGKey(0)
    k1, k2 = jax.random.split(key)
    probe_in = jax.random.normal(k1, (1, 1, c_in, 1, 1), dtype=jnp.float32)
    probe_kernel = jax.random.normal(k2, (1, 1, 1, 3, 3), dtype=jnp.float32)

    probe_out = _channel_in_kernel_forward_pallas_jit(probe_in, probe_kernel)
    probe_out_in = jax.block_until_ready(probe_out['in'])
    probe_out_kern = jax.block_until_ready(probe_out['kernel'])

    assert probe_out_in.shape == probe_in.shape
    assert probe_out_kern.shape == probe_kernel.shape
    assert bool(jnp.all(probe_out_in == probe_in))
    assert bool(jnp.all(probe_out_kern == probe_kernel))

    # Pallas-path module forward matches the direct path.
    module_pallas = ChannelInKernelPallas((c_in, c_out), use_pallas=True)
    out_p = module_pallas()
    assert bool(jnp.all(jax.block_until_ready(out_p['in']) == 0.0))
    assert bool(jnp.all(jax.block_until_ready(out_p['kernel']) == 0.0))

    print("KERNEL_OK")
</pallas_src>

<mosaic_0001>
module attributes {stable_mosaic.version = 11 : i64} {
  func.func @_passthrough_kernel(%arg0: memref<1x4xf32, #tpu.memory_space<vmem>>, %arg1: memref<1x9xf32, #tpu.memory_space<vmem>>, %arg2: memref<1x4xf32, #tpu.memory_space<vmem>>, %arg3: memref<1x9xf32, #tpu.memory_space<vmem>>) attributes {dimension_semantics = [], scalar_prefetch = 0 : i64, scratch_operands = 0 : i64, tpu.core_type = #tpu.core_type<tc>} {
    %c0 = arith.constant 0 : index
    %c0_0 = arith.constant 0 : index
    %0 = vector.load %arg0[%c0, %c0_0] : memref<1x4xf32, #tpu.memory_space<vmem>>, vector<1x4xf32>
    %c0_1 = arith.constant 0 : index
    %c0_2 = arith.constant 0 : index
    %1 = vector.load %arg2[%c0_1, %c0_2] : memref<1x4xf32, #tpu.memory_space<vmem>>, vector<1x4xf32>
    tpu.vector_store %arg2[%c0_1, %c0_2], %0 {strides = array<i32>} : memref<1x4xf32, #tpu.memory_space<vmem>>, vector<1x4xf32>,
    %c0_3 = arith.constant 0 : index
    %c0_4 = arith.constant 0 : index
    %2 = vector.load %arg1[%c0_3, %c0_4] : memref<1x9xf32, #tpu.memory_space<vmem>>, vector<1x9xf32>
    %c0_5 = arith.constant 0 : index
    %c0_6 = arith.constant 0 : index
    %3 = vector.load %arg3[%c0_5, %c0_6] : memref<1x9xf32, #tpu.memory_space<vmem>>, vector<1x9xf32>
    tpu.vector_store %arg3[%c0_5, %c0_6], %2 {strides = array<i32>} : memref<1x9xf32, #tpu.memory_space<vmem>>, vector<1x9xf32>,
    return
  }
}

</mosaic_0001>

<bundles_post_ra>
// kernel: _channel_in_kernel_forward_pallas.1
= control target key start
LH: loop header
LB: loop body
LE: loop exit
PB: predicated region body
PF: predicated region fallthrough
CT: control target
= control target key end

     0   :  { %vm14_vm0 = vcmask 24576   ;;  %vm17_vm1 = vcmask 65536   ;;  %s59_s0 = inlined_call_operand.vmem [shape: f32[1,4], index: 0, kind: input, shape index: {}, may-alias: {0,2}]   ;;  %s60_s2 = inlined_call_operand.vmem [shape: f32[1,4], index: 2, kind: output, shape index: {0}, may-alias: {0,2}]   ;;  %s61_s1 = inlined_call_operand.vmem [shape: f32[1,9], index: 1, kind: input, shape index: {}, may-alias: {1,3}]   ;;  %s62_s3 = inlined_call_operand.vmem [shape: f32[1,9], index: 3, kind: output, shape index: {1}, may-alias: {1,3}]  }
   0x1   :  { %v13_v0 = vld [vmem:[%s59_s0] sm:$0x1] }
   0x2   :  { %v16_v1 = vld [vmem:[%s61_s1] sm:$0x1]  ;;  %15 = vst.msk [vmem:[%s60_s2] sm:$0x1] %vm14_vm0, %v13_v0 }
   0x3   :  { %18 = vst.msk [vmem:[%s62_s3] sm:$0x1] %vm17_vm1, %v16_v1 }

</bundles_post_ra>
